<compile_context>
chip_gen: v5e
topology: v5e:2x2
jax: 0.10.0
libtpu: 0.0.40
codegen_flags: <defaults>
</compile_context>

<pallas_src>
import functools

import jax
import jax.numpy as jnp
from jax.experimental import pallas as pl
from jax.experimental.pallas import tpu as pltpu


# ---------------------------------------------------------------------------------------------
# Kernels
# ---------------------------------------------------------------------------------------------
def _depth_conv_kernel_full(x_ref, w_ref, o_ref, pad_ref, *, H, W, kw):
    """One (n, channel-block) tile: full H*W spatial plane flattened on the lane axis.

    x_ref:   (1, c_blk, HW)        input plane
    w_ref:   (1, c_blk, K*HW)      per-pixel taps, K folded onto the lane axis (dense reads)
    o_ref:   (1, c_blk, HW)        output plane
    pad_ref: (c_blk, HW + 2*border) zero-bordered staging scratch
    """
    K = kw * kw
    HW = H * W
    r = kw // 2
    border = r * W + r  # flat halo covering +-r row shifts and +-r column shifts

    xv = x_ref[0]  # (c_blk, HW), input dtype
    c_blk = xv.shape[0]

    # Zero border implements unfold's zero padding for out-of-range rows; out-of-range columns
    # are masked below.
    if border:
        zeros_border = jnp.zeros((c_blk, border), pad_ref.dtype)
        pad_ref[:, pl.ds(0, border)] = zeros_border
        pad_ref[:, pl.ds(border + HW, border)] = zeros_border
    pad_ref[:, pl.ds(border, HW)] = xv

    # Hoisted column-wrap masks: only 2*r distinct ones for any kw (2 for kw=3).
    col = jax.lax.broadcasted_iota(jnp.int32, (1, HW), 1) % W
    masks = {}
    for dj in range(-r, r + 1):
        if dj != 0:
            masks[dj] = ((col + dj >= 0) & (col + dj < W)).astype(jnp.float32)

    acc = jnp.zeros((c_blk, HW), jnp.float32)
    for k in range(K):  # fully unrolled; accumulate in f32 vregs
        di = k // kw - r
        dj = k % kw - r
        tap = pad_ref[:, pl.ds(border + di * W + dj, HW)].astype(jnp.float32)
        if dj != 0:  # zero the columns that wrapped into a neighbouring row
            tap = tap * masks[dj]
        wk = w_ref[0, :, pl.ds(k * HW, HW)].astype(jnp.float32)  # dense, 128-aligned lane read
        acc = acc + wk * tap
    o_ref[0] = acc.astype(o_ref.dtype)  # single lane-dense store


def _depth_conv_kernel_rows(x_ref, w_ref, o_ref, pad_ref, *, kw, rows_blk):
    """Row-blocked fallback tile for large H*W (third grid axis over row blocks).

    x_ref:   (1, c_blk, H, W)              full plane, resident across the row-block axis
    w_ref:   (1, c_blk, K, rows_blk, W)     weight row block (K kept off the tiled dims)
    o_ref:   (1, c_blk, rows_blk, W)        output row block
    pad_ref: (c_blk, rows_blk+2r, W+2r)     zero-bordered halo scratch (rebuilt every step)
    """
    K = kw * kw
    r = kw // 2
    c_blk = x_ref.shape[1]
    W = x_ref.shape[3]
    hb = pl.program_id(2)
    n_hb = pl.num_programs(2)
    row0 = pl.multiple_of(hb * rows_blk, 8)

    # Rebuild the halo scratch from the resident x plane: zero everything (gives the image-edge
    # zero padding for rows AND columns), then fill the interior and whichever row halos exist.
    pad_ref[...] = jnp.zeros_like(pad_ref)
    pad_ref[:, pl.ds(r, rows_blk), pl.ds(r, W)] = x_ref[0, :, pl.ds(row0, rows_blk), :]
    if r > 0:
        @pl.when(hb > 0)
        def _():
            pad_ref[:, pl.ds(0, r), pl.ds(r, W)] = x_ref[0, :, pl.ds(row0 - r, r), :]

        @pl.when(hb < n_hb - 1)
        def _():
            pad_ref[:, pl.ds(r + rows_blk, r), pl.ds(r, W)] = (
                x_ref[0, :, pl.ds(row0 + rows_blk, r), :])

    acc = jnp.zeros((c_blk, rows_blk, W), jnp.float32)
    for k in range(K):  # fully unrolled; all tap reads use static offsets into the halo scratch
        di = k // kw
        dj = k % kw
        tap = pad_ref[:, pl.ds(di, rows_blk), pl.ds(dj, W)].astype(jnp.float32)
        wk = w_ref[0, :, k, :, :].astype(jnp.float32)
        acc = acc + wk * tap
    o_ref[0] = acc.astype(o_ref.dtype)


# ---------------------------------------------------------------------------------------------
# Tiling / VMEM planning
# ---------------------------------------------------------------------------------------------
def _round_up(n, m):
    return -(-n // m) * m


def _vmem_caps():
    """(planning budget, vmem_limit_bytes) derived from this generation's per-core VMEM."""
    cap = 64 * 1024 * 1024  # conservative default = v7x per-TensorCore VMEM
    try:
        info = pltpu.get_tpu_info()
        cap = int(getattr(info, "vmem_capacity_bytes", cap) or cap)
    except Exception:
        pass
    cap = max(16 * 1024 * 1024, min(cap, 128 * 1024 * 1024))
    return int(cap * 0.65), int(cap * 0.80)


def _choose_tiling(N, C, H, W, kw, x_it, w_it, budget):
    """Pick a tiling plan: full-plane channel blocks, or a row-blocked spatial fallback."""
    K = kw * kw
    r = kw // 2
    HW = H * W
    border = r * W + r
    sub_x = max(8, 32 // x_it)      # sublane packing granularity per dtype
    sub_w = max(8, 32 // w_it)
    gran = max(sub_x, sub_w)

    def lanes(n):
        return _round_up(n, 128)

    def subl(n, s):
        return _round_up(n, s)

    # ---- full-plane plan (K folded onto the weight lane axis) ----
    full_cands = sorted(c for c in range(1, C + 1)
                        if C % c == 0 and (c % gran == 0 or c == C))

    def full_bytes(c):
        return (2 * subl(c, sub_x) * lanes(HW) * x_it             # x block, double buffered
                + 2 * subl(c, sub_w) * lanes(K * HW) * w_it       # weights, double buffered
                + 2 * subl(c, sub_x) * lanes(HW) * x_it           # output, double buffered
                + subl(c, sub_x) * lanes(HW + 2 * border) * x_it)  # zero-border scratch

    fitting = [c for c in full_cands if full_bytes(c) <= budget]

    # ---- row-blocked fallback plan (c is a non-tiled middle dim -> any divisor of C) ----
    row_c_cands = sorted(c for c in range(1, C + 1) if C % c == 0)
    rows_cands = [rb for rb in range(gran, H, gran) if H % rb == 0]

    def rows_bytes(c, rb):
        return (2 * c * subl(H, sub_x) * lanes(W) * x_it               # resident x plane
                + 2 * c * K * subl(rb, sub_w) * lanes(W) * w_it        # weight row block
                + 2 * c * subl(rb, sub_x) * lanes(W) * x_it            # output row block
                + c * subl(rb + 2 * r, sub_x) * lanes(W + 2 * r) * x_it)  # halo scratch

    def best_rows_plan():
        best = None
        for c in row_c_cands:
            for rb in rows_cands:
                if rows_bytes(c, rb) <= budget:
                    key = (c * rb, rb)
                    if best is None or key > best[0]:
                        best = (key, c, rb)
        if best is None:
            return None
        return {"mode": "rows", "c_blk": best[1], "rows_blk": best[2]}

    if fitting:
        best = fitting[-1]
        # Keep at least 2 (ideally >= 4) grid steps so both v7x TensorCores get work.
        for target in (4, 2):
            if N * (C // best) >= target:
                break
            smaller = [c for c in fitting if N * (C // c) >= target]
            if smaller:
                best = smaller[-1]
                break
        if N * (C // best) < 2:
            rows_plan = best_rows_plan()
            if rows_plan is not None:
                return rows_plan
        return {"mode": "full", "c_blk": best}

    rows_plan = best_rows_plan()
    if rows_plan is None:
        raise ValueError(
            "DepthConv: no tiling fits the VMEM planning budget "
            f"(budget={budget} bytes, N={N}, C={C}, H*W={HW}, kw={kw}); "
            "reduce the image size or raise max_vmem_bytes.")
    return rows_plan


# ---------------------------------------------------------------------------------------------
# Wrapper
# ---------------------------------------------------------------------------------------------
def depth_conv(x, conv_weights, kw=3, stride=1, *, max_vmem_bytes=None):
    """Pallas TPU forward pass of DepthConv (stride=1, odd kw, zero padding kw//2)."""
    if stride != 1:
        raise NotImplementedError("stride > 1")  # TODO(synk): strided unfold output grid
    assert kw % 2 == 1, "kw must be odd"
    N, C, H, W = x.shape
    K = kw * kw
    assert conv_weights.shape == (N, C * K, H, W)
    HW = H * W
    r = kw // 2
    border = r * W + r

    budget, vmem_limit = _vmem_caps()
    if max_vmem_bytes is not None:
        budget = int(max_vmem_bytes)

    plan = _choose_tiling(N, C, H, W, kw, x.dtype.itemsize, conv_weights.dtype.itemsize, budget)

    cost = pl.CostEstimate(
        flops=2 * N * C * K * HW,
        transcendentals=0,
        bytes_accessed=(N * C * HW * 2 * x.dtype.itemsize
                        + N * C * K * HW * conv_weights.dtype.itemsize))

    if plan["mode"] == "full":
        c_blk = plan["c_blk"]
        # Pure views (no HBM movement): HW on the lane axis; C*K -> (C, K*HW) keeps the PyTorch
        # .view ordering (K fastest-varying inside a channel block) while folding K onto lanes.
        x_flat = x.reshape(N, C, HW)
        w_flat = conv_weights.reshape(N, C, K * HW)
        kernel = functools.partial(_depth_conv_kernel_full, H=H, W=W, kw=kw)
        out = pl.pallas_call(
            kernel,
            out_shape=jax.ShapeDtypeStruct((N, C, HW), x.dtype),
            grid_spec=pltpu.PrefetchScalarGridSpec(
                num_scalar_prefetch=0,
                grid=(N, C // c_blk),
                in_specs=[
                    pl.BlockSpec((1, c_blk, HW), lambda n, cb: (n, cb, 0)),
                    pl.BlockSpec((1, c_blk, K * HW), lambda n, cb: (n, cb, 0)),
                ],
                out_specs=pl.BlockSpec((1, c_blk, HW), lambda n, cb: (n, cb, 0)),
                scratch_shapes=[pltpu.VMEM((c_blk, HW + 2 * border), x.dtype)],
            ),
            compiler_params=pltpu.CompilerParams(
                dimension_semantics=("parallel", "parallel"),
                vmem_limit_bytes=vmem_limit),
            cost_estimate=cost,
        )(x_flat, w_flat)
        return out.reshape(N, C, H, W)

    # Row-blocked spatial fallback: third grid axis over H-row blocks; the x plane stays resident
    # across that axis and the kw*kw tap axis stays off the tiled dims (no sublane padding).
    c_blk = plan["c_blk"]
    rows_blk = plan["rows_blk"]
    n_hb = H // rows_blk
    w_tap = conv_weights.reshape(N, C, K, H, W)  # pure view
    kernel = functools.partial(_depth_conv_kernel_rows, kw=kw, rows_blk=rows_blk)
    out = pl.pallas_call(
        kernel,
        out_shape=jax.ShapeDtypeStruct((N, C, H, W), x.dtype),
        grid_spec=pltpu.PrefetchScalarGridSpec(
            num_scalar_prefetch=0,
            grid=(N, C // c_blk, n_hb),
            in_specs=[
                pl.BlockSpec((1, c_blk, H, W), lambda n, cb, hb: (n, cb, 0, 0)),
                pl.BlockSpec((1, c_blk, K, rows_blk, W), lambda n, cb, hb: (n, cb, 0, hb, 0)),
            ],
            out_specs=pl.BlockSpec((1, c_blk, rows_blk, W), lambda n, cb, hb: (n, cb, hb, 0)),
            scratch_shapes=[pltpu.VMEM((c_blk, rows_blk + 2 * r, W + 2 * r), x.dtype)],
        ),
        compiler_params=pltpu.CompilerParams(
            dimension_semantics=("parallel", "parallel", "parallel"),
            vmem_limit_bytes=vmem_limit),
        cost_estimate=cost,
    )(x, w_tap)
    return out


# ---------------------------------------------------------------------------------------------
# Pure-JAX reference (identical to the PyTorch unfold -> mul -> sum, stride=1)
# ---------------------------------------------------------------------------------------------
def depth_conv_reference(x, conv_weights, kw=3):
    N, C, H, W = x.shape
    K = kw * kw
    r = kw // 2
    wv = conv_weights.reshape(N, C, K, H, W).astype(jnp.float32)
    xp = jnp.pad(x.astype(jnp.float32), ((0, 0), (0, 0), (r, r), (r, r)))
    out = jnp.zeros((N, C, H, W), jnp.float32)
    for k in range(K):
        ki, kj = k // kw, k % kw
        out = out + wv[:, :, k] * xp[:, :, ki:ki + H, kj:kj + W]
    return out.astype(x.dtype)


if __name__ == "__main__":
    KW = 3
    key = jax.random.PRNGKey(0)
    k1, k2, k3, k4 = jax.random.split(key, 4)

    # 1) Primary path: full-plane channel-blocked tiles, lane-dense (K*HW) weight layout.
    N, C, H, W = 2, 4, 16, 16
    x = jax.random.normal(k1, (N, C, H, W), dtype=jnp.float32)
    w = jax.random.normal(k2, (N, C * KW * KW, H, W), dtype=jnp.float32)
    out = jax.block_until_ready(depth_conv(x, w, kw=KW))
    ref = depth_conv_reference(x, w, kw=KW)
    err_full = float(jnp.max(jnp.abs(out.astype(jnp.float32) - ref.astype(jnp.float32))))

    # 2) Row-blocked fallback path, forced with a small *planning* budget so the spatial-tiling
    #    branch is exercised too (the compile-time VMEM limit itself is unchanged).
    N2, C2, H2, W2 = 1, 8, 64, 64
    x2 = jax.random.normal(k3, (N2, C2, H2, W2), dtype=jnp.float32)
    w2 = jax.random.normal(k4, (N2, C2 * KW * KW, H2, W2), dtype=jnp.float32)
    out2 = jax.block_until_ready(depth_conv(x2, w2, kw=KW, max_vmem_bytes=256 * 1024))
    ref2 = depth_conv_reference(x2, w2, kw=KW)
    err_rows = float(jnp.max(jnp.abs(out2.astype(jnp.float32) - ref2.astype(jnp.float32))))

    ok = (out.shape == (N, C, H, W) and out2.shape == (N2, C2, H2, W2)
          and err_full < 1e-4 and err_rows < 1e-4)
    if not ok:
        raise SystemExit(f"DepthConv kernel mismatch: err_full={err_full} err_rows={err_rows}")
    print("KERNEL_OK")
</pallas_src>

<mosaic_0001>
module attributes {stable_mosaic.version = 11 : i64} {
  func.func @_depth_conv_kernel_full(%arg0: i32, %arg1: i32, %arg2: memref<1x4x256xf32, #tpu.memory_space<vmem>>, %arg3: memref<1x4x2304xf32, #tpu.memory_space<vmem>>, %arg4: memref<1x4x256xf32, #tpu.memory_space<vmem>>, %arg5: memref<4x290xf32, #tpu.memory_space<vmem>>) attributes {dimension_semantics = [#tpu.dimension_semantics<parallel>, #tpu.dimension_semantics<parallel>], iteration_bounds = array<i64: 2, 1>, scalar_prefetch = 0 : i64, scratch_operands = 1 : i64, tpu.core_type = #tpu.core_type<tc>, window_params = [{transform_indices = @transform_0, window_bounds = array<i64: 1, 4, 256>}, {transform_indices = @transform_1, window_bounds = array<i64: 1, 4, 2304>}, {transform_indices = @transform_2, window_bounds = array<i64: 1, 4, 256>}]} {
    %c0 = arith.constant 0 : index
    %c0_0 = arith.constant 0 : index
    %c0_1 = arith.constant 0 : index
    %0 = vector.load %arg2[%c0, %c0_0, %c0_1] : memref<1x4x256xf32, #tpu.memory_space<vmem>>, vector<1x4x256xf32>
    %1 = vector.shape_cast %0 : vector<1x4x256xf32> to vector<4x256xf32>
    %cst = arith.constant 0.000000e+00 : f32
    %2 = vector.broadcast %cst : f32 to vector<4x17xf32>
    %c0_2 = arith.constant 0 : index
    %c0_3 = arith.constant 0 : index
    %3 = vector.load %arg5[%c0_2, %c0_3] : memref<4x290xf32, #tpu.memory_space<vmem>>, vector<4x17xf32>
    tpu.vector_store %arg5[%c0_2, %c0_3], %2 {strides = array<i32>} : memref<4x290xf32, #tpu.memory_space<vmem>>, vector<4x17xf32>,
    %c0_4 = arith.constant 0 : index
    %c273 = arith.constant 273 : index
    %4 = vector.load %arg5[%c0_4, %c273] : memref<4x290xf32, #tpu.memory_space<vmem>>, vector<4x17xf32>
    tpu.vector_store %arg5[%c0_4, %c273], %2 {strides = array<i32>} : memref<4x290xf32, #tpu.memory_space<vmem>>, vector<4x17xf32>,
    %c0_5 = arith.constant 0 : index
    %c17 = arith.constant 17 : index
    %5 = vector.load %arg5[%c0_5, %c17] : memref<4x290xf32, #tpu.memory_space<vmem>>, vector<4x256xf32>
    tpu.vector_store %arg5[%c0_5, %c17], %1 {strides = array<i32>} : memref<4x290xf32, #tpu.memory_space<vmem>>, vector<4x256xf32>,
    %6 = tpu.iota {dimensions = array<i32: 1>} : vector<1x256xi32>
    %c16_i32 = arith.constant 16 : i32
    %c0_i32 = arith.constant 0 : i32
    %7 = arith.cmpi eq, %c16_i32, %c0_i32 : i32
    %c1_i32 = arith.constant 1 : i32
    %8 = arith.select %7, %c1_i32, %c16_i32 : i32
    %9 = vector.broadcast %8 : i32 to vector<1x256xi32>
    %10 = arith.remsi %6, %9 : vector<1x256xi32>
    %c0_i32_6 = arith.constant 0 : i32
    %11 = vector.broadcast %c0_i32_6 : i32 to vector<1x256xi32>
    %12 = arith.cmpi ne, %10, %11 : vector<1x256xi32>
    %c0_i32_7 = arith.constant 0 : i32
    %13 = vector.broadcast %c0_i32_7 : i32 to vector<1x256xi32>
    %14 = arith.cmpi slt, %10, %13 : vector<1x256xi32>
    %c0_i32_8 = arith.constant 0 : i32
    %15 = arith.cmpi slt, %8, %c0_i32_8 : i32
    %16 = vector.broadcast %15 : i1 to vector<1x256xi1>
    %17 = vector.broadcast %16 : vector<1x256xi1> to vector<1x256xi1>
    %18 = arith.xori %14, %17 : vector<1x256xi1>
    %19 = arith.andi %18, %12 : vector<1x256xi1>
    %20 = vector.broadcast %8 : i32 to vector<1x256xi32>
    %21 = arith.addi %10, %20 : vector<1x256xi32>
    %22 = arith.select %19, %21, %10 : vector<1x256xi1>, vector<1x256xi32>
    %c-1_i32 = arith.constant -1 : i32
    %23 = vector.broadcast %c-1_i32 : i32 to vector<1x256xi32>
    %24 = arith.addi %22, %23 : vector<1x256xi32>
    %c0_i32_9 = arith.constant 0 : i32
    %25 = vector.broadcast %c0_i32_9 : i32 to vector<1x256xi32>
    %26 = arith.cmpi sge, %24, %25 : vector<1x256xi32>
    %c-1_i32_10 = arith.constant -1 : i32
    %27 = vector.broadcast %c-1_i32_10 : i32 to vector<1x256xi32>
    %28 = arith.addi %22, %27 : vector<1x256xi32>
    %c16_i32_11 = arith.constant 16 : i32
    %29 = vector.broadcast %c16_i32_11 : i32 to vector<1x256xi32>
    %30 = arith.cmpi slt, %28, %29 : vector<1x256xi32>
    %31 = arith.andi %26, %30 : vector<1x256xi1>
    %32 = arith.extui %31 : vector<1x256xi1> to vector<1x256xi32>
    %33 = arith.sitofp %32 : vector<1x256xi32> to vector<1x256xf32>
    %c1_i32_12 = arith.constant 1 : i32
    %34 = vector.broadcast %c1_i32_12 : i32 to vector<1x256xi32>
    %35 = arith.addi %22, %34 : vector<1x256xi32>
    %c0_i32_13 = arith.constant 0 : i32
    %36 = vector.broadcast %c0_i32_13 : i32 to vector<1x256xi32>
    %37 = arith.cmpi sge, %35, %36 : vector<1x256xi32>
    %c1_i32_14 = arith.constant 1 : i32
    %38 = vector.broadcast %c1_i32_14 : i32 to vector<1x256xi32>
    %39 = arith.addi %22, %38 : vector<1x256xi32>
    %c16_i32_15 = arith.constant 16 : i32
    %40 = vector.broadcast %c16_i32_15 : i32 to vector<1x256xi32>
    %41 = arith.cmpi slt, %39, %40 : vector<1x256xi32>
    %42 = arith.andi %37, %41 : vector<1x256xi1>
    %43 = arith.extui %42 : vector<1x256xi1> to vector<1x256xi32>
    %44 = arith.sitofp %43 : vector<1x256xi32> to vector<1x256xf32>
    %cst_16 = arith.constant 0.000000e+00 : f32
    %45 = vector.broadcast %cst_16 : f32 to vector<4x256xf32>
    %c0_17 = arith.constant 0 : index
    %c0_18 = arith.constant 0 : index
    %46 = vector.load %arg5[%c0_17, %c0_18] : memref<4x290xf32, #tpu.memory_space<vmem>>, vector<4x256xf32>
    %47 = vector.broadcast %33 : vector<1x256xf32> to vector<4x256xf32>
    %48 = arith.mulf %46, %47 : vector<4x256xf32>
    %c0_19 = arith.constant 0 : index
    %c0_20 = arith.constant 0 : index
    %c0_21 = arith.constant 0 : index
    %49 = vector.load %arg3[%c0_19, %c0_20, %c0_21] : memref<1x4x2304xf32, #tpu.memory_space<vmem>>, vector<1x4x256xf32>
    %50 = vector.shape_cast %49 : vector<1x4x256xf32> to vector<4x256xf32>
    %51 = arith.mulf %50, %48 : vector<4x256xf32>
    %52 = arith.addf %45, %51 : vector<4x256xf32>
    %c0_22 = arith.constant 0 : index
    %c1 = arith.constant 1 : index
    %53 = vector.load %arg5[%c0_22, %c1] : memref<4x290xf32, #tpu.memory_space<vmem>>, vector<4x256xf32>
    %c0_23 = arith.constant 0 : index
    %c0_24 = arith.constant 0 : index
    %c256 = arith.constant 256 : index
    %54 = vector.load %arg3[%c0_23, %c0_24, %c256] : memref<1x4x2304xf32, #tpu.memory_space<vmem>>, vector<1x4x256xf32>
    %55 = vector.shape_cast %54 : vector<1x4x256xf32> to vector<4x256xf32>
    %56 = arith.mulf %55, %53 : vector<4x256xf32>
    %57 = arith.addf %52, %56 : vector<4x256xf32>
    %c0_25 = arith.constant 0 : index
    %c2 = arith.constant 2 : index
    %58 = vector.load %arg5[%c0_25, %c2] : memref<4x290xf32, #tpu.memory_space<vmem>>, vector<4x256xf32>
    %59 = vector.broadcast %44 : vector<1x256xf32> to vector<4x256xf32>
    %60 = arith.mulf %58, %59 : vector<4x256xf32>
    %c0_26 = arith.constant 0 : index
    %c0_27 = arith.constant 0 : index
    %c512 = arith.constant 512 : index
    %61 = vector.load %arg3[%c0_26, %c0_27, %c512] : memref<1x4x2304xf32, #tpu.memory_space<vmem>>, vector<1x4x256xf32>
    %62 = vector.shape_cast %61 : vector<1x4x256xf32> to vector<4x256xf32>
    %63 = arith.mulf %62, %60 : vector<4x256xf32>
    %64 = arith.addf %57, %63 : vector<4x256xf32>
    %c0_28 = arith.constant 0 : index
    %c16 = arith.constant 16 : index
    %65 = vector.load %arg5[%c0_28, %c16] : memref<4x290xf32, #tpu.memory_space<vmem>>, vector<4x256xf32>
    %66 = vector.broadcast %33 : vector<1x256xf32> to vector<4x256xf32>
    %67 = arith.mulf %65, %66 : vector<4x256xf32>
    %c0_29 = arith.constant 0 : index
    %c0_30 = arith.constant 0 : index
    %c768 = arith.constant 768 : index
    %68 = vector.load %arg3[%c0_29, %c0_30, %c768] : memref<1x4x2304xf32, #tpu.memory_space<vmem>>, vector<1x4x256xf32>
    %69 = vector.shape_cast %68 : vector<1x4x256xf32> to vector<4x256xf32>
    %70 = arith.mulf %69, %67 : vector<4x256xf32>
    %71 = arith.addf %64, %70 : vector<4x256xf32>
    %c0_31 = arith.constant 0 : index
    %c17_32 = arith.constant 17 : index
    %72 = vector.load %arg5[%c0_31, %c17_32] : memref<4x290xf32, #tpu.memory_space<vmem>>, vector<4x256xf32>
    %c0_33 = arith.constant 0 : index
    %c0_34 = arith.constant 0 : index
    %c1024 = arith.constant 1024 : index
    %73 = vector.load %arg3[%c0_33, %c0_34, %c1024] : memref<1x4x2304xf32, #tpu.memory_space<vmem>>, vector<1x4x256xf32>
    %74 = vector.shape_cast %73 : vector<1x4x256xf32> to vector<4x256xf32>
    %75 = arith.mulf %74, %72 : vector<4x256xf32>
    %76 = arith.addf %71, %75 : vector<4x256xf32>
    %c0_35 = arith.constant 0 : index
    %c18 = arith.constant 18 : index
    %77 = vector.load %arg5[%c0_35, %c18] : memref<4x290xf32, #tpu.memory_space<vmem>>, vector<4x256xf32>
    %78 = vector.broadcast %44 : vector<1x256xf32> to vector<4x256xf32>
    %79 = arith.mulf %77, %78 : vector<4x256xf32>
    %c0_36 = arith.constant 0 : index
    %c0_37 = arith.constant 0 : index
    %c1280 = arith.constant 1280 : index
    %80 = vector.load %arg3[%c0_36, %c0_37, %c1280] : memref<1x4x2304xf32, #tpu.memory_space<vmem>>, vector<1x4x256xf32>
    %81 = vector.shape_cast %80 : vector<1x4x256xf32> to vector<4x256xf32>
    %82 = arith.mulf %81, %79 : vector<4x256xf32>
    %83 = arith.addf %76, %82 : vector<4x256xf32>
    %c0_38 = arith.constant 0 : index
    %c32 = arith.constant 32 : index
    %84 = vector.load %arg5[%c0_38, %c32] : memref<4x290xf32, #tpu.memory_space<vmem>>, vector<4x256xf32>
    %85 = vector.broadcast %33 : vector<1x256xf32> to vector<4x256xf32>
    %86 = arith.mulf %84, %85 : vector<4x256xf32>
    %c0_39 = arith.constant 0 : index
    %c0_40 = arith.constant 0 : index
    %c1536 = arith.constant 1536 : index
    %87 = vector.load %arg3[%c0_39, %c0_40, %c1536] : memref<1x4x2304xf32, #tpu.memory_space<vmem>>, vector<1x4x256xf32>
    %88 = vector.shape_cast %87 : vector<1x4x256xf32> to vector<4x256xf32>
    %89 = arith.mulf %88, %86 : vector<4x256xf32>
    %90 = arith.addf %83, %89 : vector<4x256xf32>
    %c0_41 = arith.constant 0 : index
    %c33 = arith.constant 33 : index
    %91 = vector.load %arg5[%c0_41, %c33] : memref<4x290xf32, #tpu.memory_space<vmem>>, vector<4x256xf32>
    %c0_42 = arith.constant 0 : index
    %c0_43 = arith.constant 0 : index
    %c1792 = arith.constant 1792 : index
    %92 = vector.load %arg3[%c0_42, %c0_43, %c1792] : memref<1x4x2304xf32, #tpu.memory_space<vmem>>, vector<1x4x256xf32>
    %93 = vector.shape_cast %92 : vector<1x4x256xf32> to vector<4x256xf32>
    %94 = arith.mulf %93, %91 : vector<4x256xf32>
    %95 = arith.addf %90, %94 : vector<4x256xf32>
    %c0_44 = arith.constant 0 : index
    %c34 = arith.constant 34 : index
    %96 = vector.load %arg5[%c0_44, %c34] : memref<4x290xf32, #tpu.memory_space<vmem>>, vector<4x256xf32>
    %97 = vector.broadcast %44 : vector<1x256xf32> to vector<4x256xf32>
    %98 = arith.mulf %96, %97 : vector<4x256xf32>
    %c0_45 = arith.constant 0 : index
    %c0_46 = arith.constant 0 : index
    %c2048 = arith.constant 2048 : index
    %99 = vector.load %arg3[%c0_45, %c0_46, %c2048] : memref<1x4x2304xf32, #tpu.memory_space<vmem>>, vector<1x4x256xf32>
    %100 = vector.shape_cast %99 : vector<1x4x256xf32> to vector<4x256xf32>
    %101 = arith.mulf %100, %98 : vector<4x256xf32>
    %102 = arith.addf %95, %101 : vector<4x256xf32>
    %c0_47 = arith.constant 0 : index
    %c0_48 = arith.constant 0 : index
    %c0_49 = arith.constant 0 : index
    %103 = vector.load %arg4[%c0_47, %c0_48, %c0_49] : memref<1x4x256xf32, #tpu.memory_space<vmem>>, vector<1x4x256xf32>
    %104 = vector.shape_cast %103 : vector<1x4x256xf32> to vector<4x256xf32>
    %105 = vector.shape_cast %102 : vector<4x256xf32> to vector<1x4x256xf32>
    tpu.vector_store %arg4[%c0_47, %c0_48, %c0_49], %105 {strides = array<i32>} : memref<1x4x256xf32, #tpu.memory_space<vmem>>, vector<1x4x256xf32>,
    return
  }
  func.func @transform_0(%arg0: i32, %arg1: i32) -> (i32, i32, i32) {
    %c0_i32 = arith.constant 0 : i32
    %c0_i32_0 = arith.constant 0 : i32
    return %arg0, %arg1, %c0_i32 : i32, i32, i32
  }
  func.func @transform_1(%arg0: i32, %arg1: i32) -> (i32, i32, i32) {
    %c0_i32 = arith.constant 0 : i32
    %c0_i32_0 = arith.constant 0 : i32
    return %arg0, %arg1, %c0_i32 : i32, i32, i32
  }
  func.func @transform_2(%arg0: i32, %arg1: i32) -> (i32, i32, i32) {
    %c0_i32 = arith.constant 0 : i32
    %c0_i32_0 = arith.constant 0 : i32
    return %arg0, %arg1, %c0_i32 : i32, i32, i32
  }
}

</mosaic_0001>

<bundles_post_ra>
// kernel: tpu_custom_call.1
= control target key start
LH: loop header
LB: loop body
LE: loop exit
PB: predicated region body
PF: predicated region fallthrough
CT: control target
= control target key end

     0   :  { %7 = vsyncpa [#allocation4], 0  ;;  %s1068_s0 = inlined_call_operand.hbm [shape: f32[2,4,256], index: 0, kind: input, shape index: {}]   ;;  %s1069_s1 = inlined_call_operand.hbm [shape: f32[2,4,2304], index: 1, kind: input, shape index: {}]   ;;  %s1070_s2 = inlined_call_operand.hbm [shape: f32[2,4,256], index: 2, kind: output, shape index: {}]  }
   0x1   :  { %9 = vsyncpa [#allocation4 + $0x1], 0 }
   0x2   :  { %10 = vsyncpa [#allocation7], 0 }
   0x3   :  { %12 = vsyncpa [#allocation7 + $0x1], 0 }
   0x4   :  { %13 = vsyncpa [#allocation5], 0 }
   0x5   :  { %15 = vsyncpa [#allocation5 + $0x1], 0  ;;  %s885_s9 = smov 0   ;;  %s887_s10 = smov 0  }
   0x6   :  { %s889_s11 = smov 0   ;;  %s891_s12 = smov 0  }
   0x7   :  { %s893_s13 = smov 0   ;;  %s895_s14 = smov 0  }
   0x8 LB: > { %s600_s15 = sadd.s32 4294967295, %s853_s14   ;;  %s601_s16 = sadd.s32 4294967294, %s853_s14   ;;  %s853_s14 = sphi %s895_s14, %s21_s14   ;;  %s849_s13 = sphi %s893_s13, %s1080_s13   ;;  %s845_s12 = sphi %s891_s12, %s1079_s12   ;;  %s841_s11 = sphi %s889_s11, %s1078_s11   ;;  %s837_s10 = sphi %s887_s10, %s1077_s10   ;;  %s833_s9 = sphi %s885_s9, %s1076_s9  }
   0x9   : > { %s33_s17 = sadd.s32 1, %s849_s13  ;;  %s42_s18 = sadd.s32 1, %s841_s11 }
   0xa   : > { %p35_p0 = scmp.ge.s32.totalorder %s33_s17, 2  ;;  %p49_p1 = scmp.ne.s32.totalorder %s841_s11, %s837_s10 }
   0xb   : > { %p50_p2 = scmp.eq.s32.totalorder %s853_s14, 0  ;;  %p55_p3 = scmp.ne.s32.totalorder %s837_s10, %s833_s9 }
   0xc   : > { %s1082_s17 = smov (%p35_p0, %s33_s17), 0  ;;  %p56_p5 = scmp.eq.s32.totalorder %s600_s15, 0 }
   0xd   : > { %p926_p4 = por %p50_p2, %p49_p1  ;;  %s37_s20 = ssub.s32 %s849_s13, %s1082_s17 }
   0xe   : > { %p109_p6 = scmp.eq.s32.totalorder %s600_s15, 1  ;;  %p40_p7 = scmp.eq.s32.totalorder %s37_s20, 0 }
   0xf   : > { %p932_p8 = por %p56_p5, %p55_p3  ;;  %p115_p10 = scmp.eq.s32.totalorder %s601_s16, 1 }
  0x10   : > { %p936_p9 = por %p109_p6, %p49_p1  ;;  %p603_p12 = scmp.ge.s32.totalorder %s853_s14, 2 }
  0x11   : > { %s941_s23 = scalar_select %p40_p7, %s841_s11, %s42_s18  }
  0x12   : > { %p943_p11 = por %p115_p10, %p55_p3  ;;  %p642_p13 = scmp.lt.s32.totalorder %s853_s14, 2 }
  0x13   : > { %s135_s25 = sand.u32 1, %s841_s11   ;;  %s620_s27 = sshll.u32 %s849_s13, 3 }
  0x14   : > { %s604_s26 = sshll.u32 %s135_s25, 3  ;;  %s146_s30 = scalar_lea.hbm %s1068_s0, %s620_s27 }
  0x15   : > { %s139_s3 = scalar_lea.vmem [#allocation3], %s604_s26  ;;  %s148_s5 = sshll.u32 %s146_s30, 4  ;;  %s149_s5 = int_to_ptr.hbm [resolvable:$true] %s148_s5 }
  0x16   : > { %s150_s4 = sshll.u32 %s139_s3, 4  ;;  %p956_p0 = pnand %p642_p13, %p926_p4  ;;  %s151_s4 = int_to_ptr.vmem [resolvable:$true] %s150_s4 }
  0x17   : > { %p608_p1 = scmp.ge.s32.totalorder %s853_s14, 1  ;;  %p177_p2 = scmp.lt.s32.totalorder %s853_s14, 3 }
  0x18   : > { %s136_s7 = scalar_lea.sflag [#allocation4], %s135_s25  ;;  %s622_s8 = smul.u32 72, %s135_s25 }
  0x19   : > { %634 = dma.hbm_to_vmem [thread:$0]  (!%p956_p0), %s149_s5, 128, %s151_s4, %s136_s7  }
  0x1a   : > { %p178_p3 = pnand %p608_p1, %p177_p2  ;;  %s623_s15 = smul.u32 72, %s849_s13 }
  0x1b   : > { %s161_s26 = scalar_lea.vmem [#allocation6], %s622_s8  ;;  %s158_s28 = scalar_lea.sflag [#allocation7], %s135_s25 }
  0x1c   : > { %s168_s20 = scalar_lea.hbm %s1069_s1, %s623_s15  ;;  %s172_s19 = sshll.u32 %s161_s26, 4  ;;  %s173_s19 = int_to_ptr.vmem [resolvable:$true] %s172_s19 }
  0x1d   : > { %s170_s27 = sshll.u32 %s168_s20, 4  ;;  %181 = sbr.rel (%p178_p3) target bundleno = 332 (0x14c), region = 28  ;;  %s171_s27 = int_to_ptr.hbm [resolvable:$true] %s170_s27 }
  0x1e   : > { %637 = dma.hbm_to_vmem [thread:$0]  (!%p956_p0), %s171_s27, 1152, %s173_s19, %s158_s28  }
  0x1f   : > { %s971_s29 = sand.u32 (!%p178_p3), 1, %s837_s10  }
  0x20   : > { %s609_s30 = sshll.u32 (!%p178_p3), %s971_s29, 3  ;;  %s184_s3 = scalar_lea.sflag (!%p178_p3), [#allocation4], %s971_s29 }
  0x21   : > { %s187_s4 = scalar_lea.vmem (!%p178_p3), [#allocation3], %s609_s30 }
  0x22   : > { %820 = dma.done.wait (%p932_p8), %s184_s3, 128  }
  0x23   : > { %822 = vsyncadd (%p932_p8), %s184_s3, 4294967168  ;;  %s624_s25 = smul.u32 72, %s971_s29  ;;  %s194_s5 = scalar_lea.sflag [#allocation7], %s971_s29 }
  0x25   : > { %s983_s6 = scalar_lea.vmem [#allocation6], %s624_s25 }
  0x26   : > { %824 = dma.done.wait (%p932_p8), %s194_s5, 1152  }
  0x27   : > { %826 = vsyncadd (%p932_p8), %s194_s5, 4294966144  ;;  %v242_v0 = vlaneseq  ;;  %v224_v7 = vld [vmem:[%s187_s4] sm:$0xff]  ;;  %s855_s7 = smov 17   ;;  %vm297_vm3 = vcmask 1043456   ;;  %v856_v10 = vmov 0.0   ;;  %s857_s21 = smov 16  }
  0x28   : > { %230 = vrot.lane.b32.xlu0 %v224_v7, %s855_s7  ;;  %s858_s8 = smov 32   ;;  %s859_s15 = smov 2   ;;  %vm225_vm5 = vcmask 134144   ;;  %vm227_vm6 = vcmask 273544   ;;  %vm237_vm7 = vcmask 1043592   ;;  %vm238_vm8 = vcmask 1047556  }
  0x29   : > { %v243_v1 = vand.u32 127, %v242_v0  ;;  %s860_s16 = smov 18   ;;  %s861_s18 = smov 34   ;;  %226 = vst.msk [vmem:[#allocation2] sm:$0xf] %vm225_vm5, %v856_v10  ;;  %vm233_vm9 = vcmask 138240   ;;  %vm239_vm10 = vmor %vm238_vm8, %vm237_vm7 }
  0x2a   : > { %228 = vst.msk [vmem:[#allocation2 + $0x8] sm:$0xf] %vm227_vm6, %v856_v10  ;;  %s862_s20 = smov 127   ;;  %s863_s26 = smov 112   ;;  %vm351_vm11 = vcmask 130048   ;;  %vm327_vm12 = vcmask 15360  }
  0x2b   : > { %v244_v2 = vadd.s32 128, %v243_v1  ;;  %v249_v3 = vand.u32 15, %v243_v1  ;;  %s864_s19 = smov 111   ;;  %s865_s27 = smov 96   ;;  %vm412_vm13 = vcmask 261120   ;;  %vm388_vm14 = vcmask 146432  }
  0x2c   : > { %s866_s28 = smov 95   ;;  %s867_s3 = smov 126   ;;  %vm449_vm15 = vcmask 277504   ;;  %v305_v61 = vld [vmem:[%s983_s6 + $0x8] sm:$0xff]  ;;  %vm404_vm6 = vcmask 900096   ;;  %vm441_vm7 = vcmask 777216  }
  0x2d   : > { %v256_v4 = vand.u32 15, %v244_v2  ;;  %v269_v5 = vadd.s32 4294967295, %v249_v3  ;;  %v281_v6 = vadd.s32 1, %v249_v3  ;;  %s868_s4 = smov 110   ;;  %s869_s25 = smov 94   ;;  %vm465_vm8 = vcmask 769024  }
  0x2e   : > { %s621_s5 = sshll.u32 %s845_s12, 3  ;;  %s223_s12 = scalar_lea.vmem [#allocation8], %s609_s30 }
  0x2f   : > { %v270_v8 = vadd.s32 4294967295, %v256_v4  ;;  %vm271_vm0 = vcmp.ge.s32.totalorder %v269_v5, 0  ;;  %v282_v9 = vadd.s32 1, %v256_v4  ;;  %vm285_vm1 = vcmp.lt.s32.totalorder %v281_v6, 16  ;;  %v301_v4 = vld [vmem:[%s983_s6] sm:$0xff]  ;;  %s787_s30 = scalar_lea.hbm %s1070_s2, 16 }
  0x30   : > { %v611_v11 = vsel %vm271_vm0, 1.0, %v856_v10  ;;  %v613_v13 = vsel %vm285_vm1, 1.0, %v856_v10  ;;  %vm315_vm0 = vcmask 1039360   ;;  %vm367_vm1 = vcmask 916480  }
  0x31   : > { %vm272_vm2 = vcmp.ge.s32.totalorder %v270_v8, 0  ;;  %vm286_vm4 = vcmp.lt.s32.totalorder %v282_v9, 16 }
  0x32   : > { %v612_v12 = vsel %vm272_vm2, 1.0, %v856_v10  ;;  %v614_v14 = vsel %vm286_vm4, 1.0, %v856_v10  ;;  %vm343_vm2 = vcmask 1031168   ;;  %vm380_vm4 = vcmask 908288  }
  0x33   : > { %v296_v15 = vrot.slane %v612_v12, 4  ;;  %v322_v16 = vrot.slane %v614_v14, 4 }
  0x35   : > { %v990_v17 = vsel %vm297_vm3, %v611_v11, %v296_v15  ;;  %v323_v18 = vsel %vm297_vm3, %v613_v13, %v322_v16  ;;  %v333_v11 = vld [vmem:[%s983_s6 + $0x10] sm:$0xff]  ;;  %v357_v15 = vld [vmem:[%s983_s6 + $0x18] sm:$0xff] }
  0x36   : > { %348 = vrot.lane.b32.xlu1 %v990_v17, %s857_s21  ;;  %409 = vrot.lane.b32.xlu2 %v990_v17, %s858_s8  ;;  %s485_s8 = scalar_lea.hbm %s1070_s2, %s621_s5 }
  0x37   : > { %324 = vrot.lane.b32.xlu0 %v323_v18, %s859_s15  ;;  %s487_s15 = sshll.u32 %s223_s12, 4  ;;  %s488_s15 = int_to_ptr.vmem [resolvable:$true] %s487_s15 }
  0x3e   : > { %385 = vrot.lane.b32.xlu1 %v323_v18, %s860_s16  ;;  %446 = vrot.lane.b32.xlu2 %v323_v18, %s861_s18  ;;  %s489_s16 = sshll.u32 %s485_s8, 4  ;;  %s472_s18 = scalar_lea.sflag [#allocation5], %s971_s29  ;;  %s490_s16 = int_to_ptr.hbm [resolvable:$true] %s489_s16 }
  0x90   : > { %v410_v27 = vpop.permute.xlu2 %409 }
  0x91   : > { %v411_v28 = vrot.slane %v410_v27, 4 }
  0x93   : > { %v413_v38 = vsel %vm412_vm13, %v411_v28, %v410_v27  ;;  %v372_v27 = vld [vmem:[%s983_s6 + $0x20] sm:$0xff] }
  0x98   : > { %v447_v40 = vpop.permute.xlu2 %446 }
  0x99   : > { %v448_v44 = vrot.slane %v447_v40, 4 }
  0x9a   : > { %v231_v19 = vpop.permute.xlu0 %230 }
  0x9b   : > { %v232_v20 = vrot.slane %v231_v19, 4  ;;  %v450_v45 = vsel %vm449_vm15, %v448_v44, %v447_v40 }
  0x9d   : > { %v234_v21 = vsel %vm233_vm9, %v232_v20, %v231_v19  ;;  %241 = vst.msk [vmem:[#allocation2 + $0x8] sm:$0xf] %vm225_vm5, %v232_v20  ;;  %vm428_vm5 = vcmask 785408  }
  0x9e   : > { %240 = vst.msk [vmem:[#allocation2] sm:$0xff] %vm239_vm10, %v234_v21 }
  0xa4   : > { %v304_v24 = vld [vmem:[#allocation2 + $0x8] sm:$0xf] }
  0xa5   : > { %v995_v25 = vld [vmem:[#allocation2] sm:$0xff]  ;;  %310 = vrot.lane.b32.xlu1 %v304_v24, %s862_s20  ;;  %v417_v30 = vmul.f32 %v411_v28, %v304_v24  ;;  %v454_v48 = vmul.f32 %v448_v44, %v304_v24 }
  0xa6   : > { %308 = vrot.lane.b32.xlu0 %v995_v25, %s862_s20  ;;  %v416_v41 = vmul.f32 %v413_v38, %v995_v25  ;;  %v453_v47 = vmul.f32 %v450_v45, %v995_v25  ;;  %v300_v1 = vmul.f32 %v990_v17, %v995_v25  ;;  %v418_v38 = vld [vmem:[%s983_s6 + $0x30] sm:$0xff]  ;;  %s781_s20 = sshra.s32 %s490_s16, 4  ;;  %s782_s20 = int_to_ptr.hbm [resolvable:$true] %s781_s20 }
  0xa7   : > { %p788_p7 = scmp.lt.s32.totalorder %s782_s20, %s1070_s2 }
  0xa8   : > { %v349_v22 = vpop.permute.xlu1 %348  ;;  %v302_v12 = vmul.f32 %v301_v4, %v300_v1 }
  0xa9   : > { %v350_v23 = vrot.slane %v349_v22, 4  ;;  %v325_v29 = vpop.permute.xlu0 %324 }
  0xaa   : > { %v326_v31 = vrot.slane %v325_v29, 4 }
  0xab   : > { %v356_v26 = vmul.f32 %v350_v23, %v304_v24  ;;  %v352_v32 = vsel %vm351_vm11, %v350_v23, %v349_v22 }
  0xac   : > { %v328_v33 = vsel %vm327_vm12, %v326_v31, %v325_v29  ;;  %v355_v34 = vmul.f32 %v352_v32, %v995_v25  ;;  %v332_v42 = vmul.f32 %v326_v31, %v304_v24 }
  0xad   : > { %362 = vrot.lane.b32.xlu2 %v356_v26, %s863_s26  ;;  %375 = vrot.lane.b32.xlu1 %v304_v24, %s864_s19  ;;  %v331_v36 = vmul.f32 %v328_v33, %v995_v25 }
  0xae   : > { %373 = vrot.lane.b32.xlu0 %v995_v25, %s864_s19 }
  0xb0   : > { %v386_v35 = vpop.permute.xlu1 %385 }
  0xb1   : > { %v387_v37 = vrot.slane %v386_v35, 4 }
  0xb3   : > { %v389_v39 = vsel %vm388_vm14, %v387_v37, %v386_v35  ;;  %v393_v46 = vmul.f32 %v387_v37, %v304_v24 }
  0xb4   : > { %v392_v43 = vmul.f32 %v389_v39, %v995_v25 }
  0xb5   : > { %423 = vrot.lane.b32.xlu2 %v417_v30, %s865_s27  ;;  %360 = vrot.lane.b32.xlu1 %v355_v34, %s863_s26  ;;  %v394_v34 = vld [vmem:[%s983_s6 + $0x28] sm:$0xff]  ;;  %s783_s26 = scalar_lea.hbm %s782_s20, 8 }
  0xb6   : > { %434 = vrot.lane.b32.xlu0 %v995_v25, %s866_s28  ;;  %p784_p4 = scmp.ne.s32.totalorder %s782_s20, %s783_s26  ;;  %p789_p8 = scmp.lt.s32.totalorder %s787_s30, %s783_s26 }
  0xb8   : > { %p785_p5 = pnand %p784_p4, %p936_p9  ;;  %p790_p10 = por %p789_p8, %p788_p7 }
  0xba   : > { %p786_p6 = pneg %p785_p5 }
  0xbc   : > { %p791_p13 = pnand %p790_p10, %p786_p6 }
  0xbd   : > { %336 = vrot.lane.b32.xlu2 %v331_v36, %s867_s3  ;;  %421 = vrot.lane.b32.xlu1 %v416_v41, %s865_s27 }
  0xbe   : > { %338 = vrot.lane.b32.xlu0 %v332_v42, %s867_s3 }
  0xc5   : > { %397 = vrot.lane.b32.xlu2 %v392_v43, %s868_s4  ;;  %436 = vrot.lane.b32.xlu1 %v304_v24, %s866_s28 }
  0xc6   : > { %399 = vrot.lane.b32.xlu0 %v393_v46, %s868_s4 }
  0xcd   : > { %458 = vrot.lane.b32.xlu2 %v453_v47, %s869_s25  ;;  %v433_v47 = vld [vmem:[%s983_s6 + $0x38] sm:$0xff] }
  0xce   : > { %460 = vrot.lane.b32.xlu0 %v454_v48, %s869_s25 }
 0x107   : > { %v363_v49 = vpop.permute.xlu2 %362 }
 0x108   : > { %v365_v0 = vrot.slane %v363_v49, 4 }
 0x10f   : > { %v424_v53 = vpop.permute.xlu2 %423 }
 0x110   : > { %v426_v22 = vrot.slane %v424_v53, 4  ;;  %v455_v53 = vld [vmem:[%s983_s6 + $0x40] sm:$0xff] }
 0x117   : > { %v311_v50 = vpop.permute.xlu1 %310  ;;  %v337_v59 = vpop.permute.xlu2 %336 }
 0x118   : > { %v309_v51 = vpop.permute.xlu0 %308  ;;  %v313_v55 = vrot.slane %v311_v50, 4  ;;  %v340_v3 = vrot.slane %v337_v59, 4 }
 0x119   : > { %v312_v56 = vrot.slane %v309_v51, 4 }
 0x11b   : > { %v314_v60 = vsel %vm297_vm3, %v312_v56, %v313_v55 }
 0x11c   : > { %v316_v62 = vsel %vm315_vm0, %v309_v51, %v314_v60 }
 0x11d   : > { %v318_v5 = vmul.f32 %v316_v62, %v305_v61 }
 0x11f   : > { %v376_v52 = vpop.permute.xlu1 %375  ;;  %v398_v14 = vpop.permute.xlu2 %397  ;;  %v319_v18 = vadd.f32 %v318_v5, %v302_v12 }
 0x120   : > { %v374_v54 = vpop.permute.xlu0 %373  ;;  %v378_v7 = vrot.slane %v376_v52, 4  ;;  %v401_v26 = vrot.slane %v398_v14, 4 }
 0x121   : > { %v377_v8 = vrot.slane %v374_v54, 4 }
 0x123   : > { %v379_v19 = vsel %vm297_vm3, %v377_v8, %v378_v7 }
 0x124   : > { %v381_v28 = vsel %vm380_vm4, %v374_v54, %v379_v19 }
 0x125   : > { %v383_v35 = vmul.f32 %v381_v28, %v372_v27 }
 0x127   : > { %v361_v57 = vpop.permute.xlu1 %360  ;;  %v459_v44 = vpop.permute.xlu2 %458 }
 0x128   : > { %v1005_v58 = vpop.permute.xlu0 %434  ;;  %v364_v63 = vrot.slane %v361_v57, 4  ;;  %v462_v50 = vrot.slane %v459_v44, 4 }
 0x129   : > { %v438_v36 = vrot.slane %v1005_v58, 4 }
 0x12a   : > { %v366_v9 = vsel %vm297_vm3, %v364_v63, %v365_v0 }
 0x12b   : > { %v368_v16 = vsel %vm367_vm1, %v361_v57, %v366_v9 }
 0x12c   : > { %v370_v23 = vmul.f32 %v368_v16, %v357_v15 }
 0x12f   : > { %v422_v2 = vpop.permute.xlu1 %421 }
 0x130   : > { %v339_v6 = vpop.permute.xlu0 %338  ;;  %v425_v20 = vrot.slane %v422_v2, 4 }
 0x131   : > { %v341_v10 = vrot.slane %v339_v6, 4 }
 0x132   : > { %v427_v30 = vsel %vm297_vm3, %v425_v20, %v426_v22 }
 0x133   : > { %v342_v13 = vsel %vm297_vm3, %v340_v3, %v341_v10  ;;  %v429_v39 = vsel %vm428_vm5, %v422_v2, %v427_v30 }
 0x134   : > { %v344_v17 = vsel %vm343_vm2, %v337_v59, %v342_v13  ;;  %v431_v45 = vmul.f32 %v429_v39, %v418_v38 }
 0x135   : > { %v346_v21 = vmul.f32 %v344_v17, %v333_v11 }
 0x137   : > { %v347_v24 = vadd.f32 %v346_v21, %v319_v18  ;;  %v437_v25 = vpop.permute.xlu1 %436 }
 0x138   : > { %v400_v29 = vpop.permute.xlu0 %399  ;;  %v439_v32 = vrot.slane %v437_v25, 4 }
 0x139   : > { %v371_v31 = vadd.f32 %v370_v23, %v347_v24  ;;  %v402_v33 = vrot.slane %v400_v29, 4 }
 0x13a   : > { %v440_v41 = vsel %vm297_vm3, %v438_v36, %v439_v32 }
 0x13b   : > { %v403_v37 = vsel %vm297_vm3, %v401_v26, %v402_v33  ;;  %v384_v42 = vadd.f32 %v383_v35, %v371_v31  ;;  %v442_v48 = vsel %vm441_vm7, %v1005_v58, %v440_v41 }
 0x13c   : > { %v405_v40 = vsel %vm404_vm6, %v398_v14, %v403_v37  ;;  %v444_v54 = vmul.f32 %v442_v48, %v433_v47 }
 0x13d   : > { %v407_v43 = vmul.f32 %v405_v40, %v394_v34 }
 0x13f   : > { %v408_v46 = vadd.f32 %v407_v43, %v384_v42 }
 0x140   : > { %v461_v49 = vpop.permute.xlu0 %460 }
 0x141   : > { %v432_v51 = vadd.f32 %v431_v45, %v408_v46  ;;  %v463_v52 = vrot.slane %v461_v49, 4 }
 0x143   : > { %v464_v55 = vsel %vm297_vm3, %v462_v50, %v463_v52  ;;  %v445_v57 = vadd.f32 %v444_v54, %v432_v51 }
 0x144   : > { %v466_v56 = vsel %vm465_vm8, %v459_v44, %v464_v55 }
 0x145   : > { %v468_v58 = vmul.f32 %v466_v56, %v455_v53 }
 0x147   : > { %v469_v59 = vadd.f32 %v468_v58, %v445_v57 }
 0x149   : > { %470 = vst [vmem:[%s223_s12] sm:$0xff] %v469_v59 }
 0x14a   : > { %794 = shalt.err (!%p791_p13)
}
 0x14b   : > { %629 = dma.vmem_to_hbm [thread:$0]  (%p936_p9), %s488_s15, 128, %s490_s16, %s472_s18  }
 0x14c PF: > { %s501_s29 = sand.u32 1, %s833_s9   ;;  %p639_p0 = pnand %p603_p12, %p943_p11 }
 0x14d   : > { %s502_s3 = scalar_lea.sflag [#allocation5], %s501_s29 }
 0x14e   : > { %p640_p1 = pneg %p639_p0 }
 0x150   : > { %828 = dma.done.wait (%p640_p1), %s502_s3, 128  }
 0x151   : > { %830 = vsyncadd (%p640_p1), %s502_s3, 4294967168  ;;  %s21_s14 = sadd.s32 1, %s853_s14   ;;  %s1076_s9 = smov %s837_s10 }
 0x152   : > { %p18_p2 = scmp.ge.s32.totalorder %s21_s14, 4   ;;  %s1077_s10 = smov %s841_s11 }
 0x153   : > { %s1078_s11 = smov %s941_s23  ;;  %s1079_s12 = smov %s849_s13 }
 0x154   : > { %s1080_s13 = smov %s1082_s17  ;;  %20 = sbr.rel (!%p18_p2) target bundleno = 8 (0x8), region = 86 }
 0x159   :  { %508 = vsyncpa [#allocation4], 1 }
 0x15a   :  { %510 = vsyncpa [#allocation4 + $0x1], 1 }
 0x15b   :  { %511 = vsyncpa [#allocation7], 1 }
 0x15c   :  { %513 = vsyncpa [#allocation7 + $0x1], 1 }
 0x15d   :  { %514 = vsyncpa [#allocation5], 1 }
 0x15e   :  { %516 = vsyncpa [#allocation5 + $0x1], 1 }

</bundles_post_ra>
